<compile_context>
chip_gen: v6e
topology: v6e:2x2x1
jax: 0.10.0
libtpu: 0.0.40
codegen_flags: <defaults>
</compile_context>

<pallas_src>
import jax
import jax.numpy as jnp
from jax.experimental import pallas as pl
from jax.experimental.pallas import tpu as pltpu


def lstm_kernel(x_ref, wih_ref, whh_ref, head_ref, out_ref):
    """Whole sequence fits in VMEM; the time recurrence is a fully unrolled
    straight-line loop carrying (h, c) in f32.  Only the recurrent matmul,
    one full-vreg tanh, one small tanh(c) and the elementwise combine sit on
    the serial per-step chain."""
    T = x_ref.shape[0]
    H = whh_ref.shape[0]
    G = whh_ref.shape[1]          # 4H

    # ---- Hoisted out of the recurrence -----------------------------------
    # Input projection for all T steps in one batched bf16 matmul (bias is
    # folded in via the ones column of x / bias row of W_ih^T).  Kept as a
    # value in vregs: (T, 4H) f32 = one vreg set, no VMEM round-trip.
    xproj = jnp.dot(x_ref[...], wih_ref[...],
                    preferred_element_type=jnp.float32)      # (T, 4H) f32

    whh = whh_ref[...]                                       # (H, 4H) bf16
    # Hoisted full-vreg constant: sigmoid(z) = 0.5 * tanh(z/2) + 0.5
    # (i/f/o gate columns were pre-scaled by 0.5 in the wrapper).
    half = jnp.full((1, G), 0.5, jnp.float32)

    h = jnp.zeros((1, H), jnp.float32)
    c = jnp.zeros((1, H), jnp.float32)

    # Fully unrolled recurrence (T is static and tiny): static slices of
    # xproj, full cross-iteration visibility for the scheduler.
    for t in range(T):
        # Only the recurrent matmul is on the per-step critical path; the
        # carry stays f32, only the MXU operand is cast to bf16.
        gates = xproj[t:t + 1, :] + jnp.dot(
            h.astype(jnp.bfloat16), whh,
            preferred_element_type=jnp.float32)               # (1, 4H) f32
        # One EUP dispatch over the full gate vreg.
        t_all = jnp.tanh(gates)
        s_all = half * t_all + half          # sigmoids in i/f/o lanes
        i_g = s_all[:, 0 * H:1 * H]
        f_g = s_all[:, 1 * H:2 * H]
        g_g = t_all[:, 2 * H:3 * H]
        o_g = s_all[:, 3 * H:4 * H]
        c = f_g * c + i_g * g_g
        h = o_g * jnp.tanh(c)

    # Output head on VPU/XLU: lane multiply + cross-lane reduce (avoids a
    # degenerate N=1 MXU pass with fill/drain latency in the kernel tail).
    head = head_ref[...]                     # (1, H + O) f32, O == 1
    wlin_row = head[:, :H]                   # (1, H)
    blin = head[:, H:]                       # (1, O)
    out_ref[...] = jnp.sum(h * wlin_row, axis=-1, keepdims=True) + blin


def lstm_forward(x, w_ih, w_hh, b_ih, b_hh, w_lin, b_lin):
    """x: (T, I) float32.  Returns (output_size,) = linear(h_T)."""
    T, I = x.shape
    H = w_hh.shape[1]
    O = w_lin.shape[0]
    G = 4 * H
    assert O == 1, "module spec uses output_size=1"

    # Pre-scale the i/f/o gate columns by 0.5 so the kernel can recover
    # sigmoid(z) = 0.5 * tanh(z/2) + 0.5 from a single full-width tanh.
    # Gate order (PyTorch): [i, f, g, o].  Scaling by 0.5 is exact in binary.
    col_scale = jnp.concatenate([
        jnp.full((2 * H,), 0.5, jnp.float32),   # i, f
        jnp.ones((H,), jnp.float32),            # g (stays tanh)
        jnp.full((H,), 0.5, jnp.float32),       # o
    ])

    # Fold the (scaled) bias into the input projection: append a bias row to
    # W_ih^T and a ones column to x.  Both cast to bf16 (f32 accumulation in
    # the kernel); this is off the serial chain.
    bias_row = ((b_ih + b_hh) * col_scale).reshape(1, G)
    wih_aug = jnp.concatenate([w_ih.T * col_scale[None, :], bias_row],
                              axis=0).astype(jnp.bfloat16)        # (I+1, 4H)
    x_aug = jnp.concatenate([x, jnp.ones((T, 1), x.dtype)],
                            axis=1).astype(jnp.bfloat16)          # (T, I+1)
    whh_t = (w_hh.T * col_scale[None, :]).astype(jnp.bfloat16)    # (H, 4H)
    # Pack the linear head (weights + bias) into a single f32 row.
    head = jnp.concatenate([w_lin.reshape(1, H),
                            b_lin.reshape(1, O)],
                           axis=1).astype(jnp.float32)            # (1, H+O)

    out = pl.pallas_call(
        lstm_kernel,
        out_shape=jax.ShapeDtypeStruct((1, O), jnp.float32),
        in_specs=[
            pl.BlockSpec(memory_space=pltpu.VMEM),   # x_aug    (T, I+1) bf16
            pl.BlockSpec(memory_space=pltpu.VMEM),   # W_ih^T+b (I+1, 4H) bf16
            pl.BlockSpec(memory_space=pltpu.VMEM),   # W_hh^T   (H, 4H)  bf16
            pl.BlockSpec(memory_space=pltpu.VMEM),   # head     (1, H+O) f32
        ],
        out_specs=pl.BlockSpec(memory_space=pltpu.VMEM),
    )(x_aug, wih_aug, whh_t, head)
    return out.reshape(O)


def _reference(x, w_ih, w_hh, b_ih, b_hh, w_lin, b_lin):
    """Pure-JAX f32 reference of the same semantics (PyTorch gate order i,f,g,o)."""
    T, I = x.shape
    H = w_hh.shape[1]
    h = jnp.zeros((H,), jnp.float32)
    c = jnp.zeros((H,), jnp.float32)
    for t in range(T):
        g = w_ih @ x[t] + b_ih + w_hh @ h + b_hh
        i_g = jax.nn.sigmoid(g[0 * H:1 * H])
        f_g = jax.nn.sigmoid(g[1 * H:2 * H])
        g_g = jnp.tanh(g[2 * H:3 * H])
        o_g = jax.nn.sigmoid(g[3 * H:4 * H])
        c = f_g * c + i_g * g_g
        h = o_g * jnp.tanh(c)
    return w_lin @ h + b_lin


if __name__ == "__main__":
    # Small, deterministic config: seq_len=8, input_size=4, hidden=32, output=1
    T, I, H, O = 8, 4, 32, 1
    key = jax.random.PRNGKey(0)
    ks = jax.random.split(key, 7)
    bound = 1.0 / jnp.sqrt(H)

    x     = jax.random.normal(ks[0], (T, I), dtype=jnp.float32)
    w_ih  = jax.random.uniform(ks[1], (4 * H, I), jnp.float32, -bound, bound)
    w_hh  = jax.random.uniform(ks[2], (4 * H, H), jnp.float32, -bound, bound)
    b_ih  = jax.random.uniform(ks[3], (4 * H,),   jnp.float32, -bound, bound)
    b_hh  = jax.random.uniform(ks[4], (4 * H,),   jnp.float32, -bound, bound)
    w_lin = jax.random.uniform(ks[5], (O, H),     jnp.float32, -bound, bound)
    b_lin = jax.random.uniform(ks[6], (O,),       jnp.float32, -bound, bound)

    pred = lstm_forward(x, w_ih, w_hh, b_ih, b_hh, w_lin, b_lin)
    jax.block_until_ready(pred)

    ref = _reference(x, w_ih, w_hh, b_ih, b_hh, w_lin, b_lin)
    assert pred.shape == (O,)
    # bf16 MXU operands (f32 accumulation) on both matmuls -> relaxed tolerance;
    # h/c carries and all VPU/EUP math stay f32.
    assert jnp.allclose(pred, ref, atol=1e-2, rtol=1e-2), (pred, ref)

    print("KERNEL_OK")
</pallas_src>

<mosaic_0001>
module attributes {stable_mosaic.version = 11 : i64} {
  func.func @lstm_kernel(%arg0: memref<8x5xbf16, #tpu.memory_space<vmem>>, %arg1: memref<5x128xbf16, #tpu.memory_space<vmem>>, %arg2: memref<32x128xbf16, #tpu.memory_space<vmem>>, %arg3: memref<1x33xf32, #tpu.memory_space<vmem>>, %arg4: memref<1x1xf32, #tpu.memory_space<vmem>>) attributes {dimension_semantics = [], scalar_prefetch = 0 : i64, scratch_operands = 0 : i64, tpu.core_type = #tpu.core_type<tc>} {
    %c0 = arith.constant 0 : index
    %c0_0 = arith.constant 0 : index
    %0 = vector.load %arg0[%c0, %c0_0] : memref<8x5xbf16, #tpu.memory_space<vmem>>, vector<8x5xbf16>
    %c0_1 = arith.constant 0 : index
    %c0_2 = arith.constant 0 : index
    %1 = vector.load %arg1[%c0_1, %c0_2] : memref<5x128xbf16, #tpu.memory_space<vmem>>, vector<5x128xbf16>
    %cst = arith.constant dense<0.000000e+00> : vector<8x128xf32>
    %2 = tpu.matmul %0, %1, %cst {dimension_numbers = #tpu.dot_dimension_numbers<[1], [0], [0], [1], [0, 0, 1, 1], [], []>} : vector<8x5xbf16>, vector<5x128xbf16>, vector<8x128xf32> -> vector<8x128xf32>
    %c0_3 = arith.constant 0 : index
    %c0_4 = arith.constant 0 : index
    %3 = vector.load %arg2[%c0_3, %c0_4] : memref<32x128xbf16, #tpu.memory_space<vmem>>, vector<32x128xbf16>
    %cst_5 = arith.constant 5.000000e-01 : f32
    %4 = vector.broadcast %cst_5 : f32 to vector<1x128xf32>
    %cst_6 = arith.constant 0.000000e+00 : f32
    %5 = vector.broadcast %cst_6 : f32 to vector<1x32xf32>
    %cst_7 = arith.constant 0.000000e+00 : f32
    %6 = vector.broadcast %cst_7 : f32 to vector<1x32xf32>
    %7 = vector.extract_strided_slice %2 {offsets = [0, 0], sizes = [1, 128], strides = [1, 1]} : vector<8x128xf32> to vector<1x128xf32>
    %8 = arith.truncf %5 : vector<1x32xf32> to vector<1x32xbf16>
    %cst_8 = arith.constant dense<0.000000e+00> : vector<1x128xf32>
    %9 = tpu.matmul %8, %3, %cst_8 {dimension_numbers = #tpu.dot_dimension_numbers<[1], [0], [0], [1], [0, 0, 1, 1], [], []>} : vector<1x32xbf16>, vector<32x128xbf16>, vector<1x128xf32> -> vector<1x128xf32>
    %10 = arith.addf %7, %9 : vector<1x128xf32>
    %11 = math.tanh %10 : vector<1x128xf32>
    %12 = arith.mulf %4, %11 : vector<1x128xf32>
    %13 = arith.addf %12, %4 : vector<1x128xf32>
    %14 = vector.extract_strided_slice %13 {offsets = [0, 0], sizes = [1, 32], strides = [1, 1]} : vector<1x128xf32> to vector<1x32xf32>
    %15 = vector.extract_strided_slice %13 {offsets = [0, 32], sizes = [1, 32], strides = [1, 1]} : vector<1x128xf32> to vector<1x32xf32>
    %16 = vector.extract_strided_slice %11 {offsets = [0, 64], sizes = [1, 32], strides = [1, 1]} : vector<1x128xf32> to vector<1x32xf32>
    %17 = vector.extract_strided_slice %13 {offsets = [0, 96], sizes = [1, 32], strides = [1, 1]} : vector<1x128xf32> to vector<1x32xf32>
    %18 = arith.mulf %15, %6 : vector<1x32xf32>
    %19 = arith.mulf %14, %16 : vector<1x32xf32>
    %20 = arith.addf %18, %19 : vector<1x32xf32>
    %21 = math.tanh %20 : vector<1x32xf32>
    %22 = arith.mulf %17, %21 : vector<1x32xf32>
    %23 = vector.extract_strided_slice %2 {offsets = [1, 0], sizes = [1, 128], strides = [1, 1]} : vector<8x128xf32> to vector<1x128xf32>
    %24 = arith.truncf %22 : vector<1x32xf32> to vector<1x32xbf16>
    %cst_9 = arith.constant dense<0.000000e+00> : vector<1x128xf32>
    %25 = tpu.matmul %24, %3, %cst_9 {dimension_numbers = #tpu.dot_dimension_numbers<[1], [0], [0], [1], [0, 0, 1, 1], [], []>} : vector<1x32xbf16>, vector<32x128xbf16>, vector<1x128xf32> -> vector<1x128xf32>
    %26 = arith.addf %23, %25 : vector<1x128xf32>
    %27 = math.tanh %26 : vector<1x128xf32>
    %28 = arith.mulf %4, %27 : vector<1x128xf32>
    %29 = arith.addf %28, %4 : vector<1x128xf32>
    %30 = vector.extract_strided_slice %29 {offsets = [0, 0], sizes = [1, 32], strides = [1, 1]} : vector<1x128xf32> to vector<1x32xf32>
    %31 = vector.extract_strided_slice %29 {offsets = [0, 32], sizes = [1, 32], strides = [1, 1]} : vector<1x128xf32> to vector<1x32xf32>
    %32 = vector.extract_strided_slice %27 {offsets = [0, 64], sizes = [1, 32], strides = [1, 1]} : vector<1x128xf32> to vector<1x32xf32>
    %33 = vector.extract_strided_slice %29 {offsets = [0, 96], sizes = [1, 32], strides = [1, 1]} : vector<1x128xf32> to vector<1x32xf32>
    %34 = arith.mulf %31, %20 : vector<1x32xf32>
    %35 = arith.mulf %30, %32 : vector<1x32xf32>
    %36 = arith.addf %34, %35 : vector<1x32xf32>
    %37 = math.tanh %36 : vector<1x32xf32>
    %38 = arith.mulf %33, %37 : vector<1x32xf32>
    %39 = vector.extract_strided_slice %2 {offsets = [2, 0], sizes = [1, 128], strides = [1, 1]} : vector<8x128xf32> to vector<1x128xf32>
    %40 = arith.truncf %38 : vector<1x32xf32> to vector<1x32xbf16>
    %cst_10 = arith.constant dense<0.000000e+00> : vector<1x128xf32>
    %41 = tpu.matmul %40, %3, %cst_10 {dimension_numbers = #tpu.dot_dimension_numbers<[1], [0], [0], [1], [0, 0, 1, 1], [], []>} : vector<1x32xbf16>, vector<32x128xbf16>, vector<1x128xf32> -> vector<1x128xf32>
    %42 = arith.addf %39, %41 : vector<1x128xf32>
    %43 = math.tanh %42 : vector<1x128xf32>
    %44 = arith.mulf %4, %43 : vector<1x128xf32>
    %45 = arith.addf %44, %4 : vector<1x128xf32>
    %46 = vector.extract_strided_slice %45 {offsets = [0, 0], sizes = [1, 32], strides = [1, 1]} : vector<1x128xf32> to vector<1x32xf32>
    %47 = vector.extract_strided_slice %45 {offsets = [0, 32], sizes = [1, 32], strides = [1, 1]} : vector<1x128xf32> to vector<1x32xf32>
    %48 = vector.extract_strided_slice %43 {offsets = [0, 64], sizes = [1, 32], strides = [1, 1]} : vector<1x128xf32> to vector<1x32xf32>
    %49 = vector.extract_strided_slice %45 {offsets = [0, 96], sizes = [1, 32], strides = [1, 1]} : vector<1x128xf32> to vector<1x32xf32>
    %50 = arith.mulf %47, %36 : vector<1x32xf32>
    %51 = arith.mulf %46, %48 : vector<1x32xf32>
    %52 = arith.addf %50, %51 : vector<1x32xf32>
    %53 = math.tanh %52 : vector<1x32xf32>
    %54 = arith.mulf %49, %53 : vector<1x32xf32>
    %55 = vector.extract_strided_slice %2 {offsets = [3, 0], sizes = [1, 128], strides = [1, 1]} : vector<8x128xf32> to vector<1x128xf32>
    %56 = arith.truncf %54 : vector<1x32xf32> to vector<1x32xbf16>
    %cst_11 = arith.constant dense<0.000000e+00> : vector<1x128xf32>
    %57 = tpu.matmul %56, %3, %cst_11 {dimension_numbers = #tpu.dot_dimension_numbers<[1], [0], [0], [1], [0, 0, 1, 1], [], []>} : vector<1x32xbf16>, vector<32x128xbf16>, vector<1x128xf32> -> vector<1x128xf32>
    %58 = arith.addf %55, %57 : vector<1x128xf32>
    %59 = math.tanh %58 : vector<1x128xf32>
    %60 = arith.mulf %4, %59 : vector<1x128xf32>
    %61 = arith.addf %60, %4 : vector<1x128xf32>
    %62 = vector.extract_strided_slice %61 {offsets = [0, 0], sizes = [1, 32], strides = [1, 1]} : vector<1x128xf32> to vector<1x32xf32>
    %63 = vector.extract_strided_slice %61 {offsets = [0, 32], sizes = [1, 32], strides = [1, 1]} : vector<1x128xf32> to vector<1x32xf32>
    %64 = vector.extract_strided_slice %59 {offsets = [0, 64], sizes = [1, 32], strides = [1, 1]} : vector<1x128xf32> to vector<1x32xf32>
    %65 = vector.extract_strided_slice %61 {offsets = [0, 96], sizes = [1, 32], strides = [1, 1]} : vector<1x128xf32> to vector<1x32xf32>
    %66 = arith.mulf %63, %52 : vector<1x32xf32>
    %67 = arith.mulf %62, %64 : vector<1x32xf32>
    %68 = arith.addf %66, %67 : vector<1x32xf32>
    %69 = math.tanh %68 : vector<1x32xf32>
    %70 = arith.mulf %65, %69 : vector<1x32xf32>
    %71 = vector.extract_strided_slice %2 {offsets = [4, 0], sizes = [1, 128], strides = [1, 1]} : vector<8x128xf32> to vector<1x128xf32>
    %72 = arith.truncf %70 : vector<1x32xf32> to vector<1x32xbf16>
    %cst_12 = arith.constant dense<0.000000e+00> : vector<1x128xf32>
    %73 = tpu.matmul %72, %3, %cst_12 {dimension_numbers = #tpu.dot_dimension_numbers<[1], [0], [0], [1], [0, 0, 1, 1], [], []>} : vector<1x32xbf16>, vector<32x128xbf16>, vector<1x128xf32> -> vector<1x128xf32>
    %74 = arith.addf %71, %73 : vector<1x128xf32>
    %75 = math.tanh %74 : vector<1x128xf32>
    %76 = arith.mulf %4, %75 : vector<1x128xf32>
    %77 = arith.addf %76, %4 : vector<1x128xf32>
    %78 = vector.extract_strided_slice %77 {offsets = [0, 0], sizes = [1, 32], strides = [1, 1]} : vector<1x128xf32> to vector<1x32xf32>
    %79 = vector.extract_strided_slice %77 {offsets = [0, 32], sizes = [1, 32], strides = [1, 1]} : vector<1x128xf32> to vector<1x32xf32>
    %80 = vector.extract_strided_slice %75 {offsets = [0, 64], sizes = [1, 32], strides = [1, 1]} : vector<1x128xf32> to vector<1x32xf32>
    %81 = vector.extract_strided_slice %77 {offsets = [0, 96], sizes = [1, 32], strides = [1, 1]} : vector<1x128xf32> to vector<1x32xf32>
    %82 = arith.mulf %79, %68 : vector<1x32xf32>
    %83 = arith.mulf %78, %80 : vector<1x32xf32>
    %84 = arith.addf %82, %83 : vector<1x32xf32>
    %85 = math.tanh %84 : vector<1x32xf32>
    %86 = arith.mulf %81, %85 : vector<1x32xf32>
    %87 = vector.extract_strided_slice %2 {offsets = [5, 0], sizes = [1, 128], strides = [1, 1]} : vector<8x128xf32> to vector<1x128xf32>
    %88 = arith.truncf %86 : vector<1x32xf32> to vector<1x32xbf16>
    %cst_13 = arith.constant dense<0.000000e+00> : vector<1x128xf32>
    %89 = tpu.matmul %88, %3, %cst_13 {dimension_numbers = #tpu.dot_dimension_numbers<[1], [0], [0], [1], [0, 0, 1, 1], [], []>} : vector<1x32xbf16>, vector<32x128xbf16>, vector<1x128xf32> -> vector<1x128xf32>
    %90 = arith.addf %87, %89 : vector<1x128xf32>
    %91 = math.tanh %90 : vector<1x128xf32>
    %92 = arith.mulf %4, %91 : vector<1x128xf32>
    %93 = arith.addf %92, %4 : vector<1x128xf32>
    %94 = vector.extract_strided_slice %93 {offsets = [0, 0], sizes = [1, 32], strides = [1, 1]} : vector<1x128xf32> to vector<1x32xf32>
    %95 = vector.extract_strided_slice %93 {offsets = [0, 32], sizes = [1, 32], strides = [1, 1]} : vector<1x128xf32> to vector<1x32xf32>
    %96 = vector.extract_strided_slice %91 {offsets = [0, 64], sizes = [1, 32], strides = [1, 1]} : vector<1x128xf32> to vector<1x32xf32>
    %97 = vector.extract_strided_slice %93 {offsets = [0, 96], sizes = [1, 32], strides = [1, 1]} : vector<1x128xf32> to vector<1x32xf32>
    %98 = arith.mulf %95, %84 : vector<1x32xf32>
    %99 = arith.mulf %94, %96 : vector<1x32xf32>
    %100 = arith.addf %98, %99 : vector<1x32xf32>
    %101 = math.tanh %100 : vector<1x32xf32>
    %102 = arith.mulf %97, %101 : vector<1x32xf32>
    %103 = vector.extract_strided_slice %2 {offsets = [6, 0], sizes = [1, 128], strides = [1, 1]} : vector<8x128xf32> to vector<1x128xf32>
    %104 = arith.truncf %102 : vector<1x32xf32> to vector<1x32xbf16>
    %cst_14 = arith.constant dense<0.000000e+00> : vector<1x128xf32>
    %105 = tpu.matmul %104, %3, %cst_14 {dimension_numbers = #tpu.dot_dimension_numbers<[1], [0], [0], [1], [0, 0, 1, 1], [], []>} : vector<1x32xbf16>, vector<32x128xbf16>, vector<1x128xf32> -> vector<1x128xf32>
    %106 = arith.addf %103, %105 : vector<1x128xf32>
    %107 = math.tanh %106 : vector<1x128xf32>
    %108 = arith.mulf %4, %107 : vector<1x128xf32>
    %109 = arith.addf %108, %4 : vector<1x128xf32>
    %110 = vector.extract_strided_slice %109 {offsets = [0, 0], sizes = [1, 32], strides = [1, 1]} : vector<1x128xf32> to vector<1x32xf32>
    %111 = vector.extract_strided_slice %109 {offsets = [0, 32], sizes = [1, 32], strides = [1, 1]} : vector<1x128xf32> to vector<1x32xf32>
    %112 = vector.extract_strided_slice %107 {offsets = [0, 64], sizes = [1, 32], strides = [1, 1]} : vector<1x128xf32> to vector<1x32xf32>
    %113 = vector.extract_strided_slice %109 {offsets = [0, 96], sizes = [1, 32], strides = [1, 1]} : vector<1x128xf32> to vector<1x32xf32>
    %114 = arith.mulf %111, %100 : vector<1x32xf32>
    %115 = arith.mulf %110, %112 : vector<1x32xf32>
    %116 = arith.addf %114, %115 : vector<1x32xf32>
    %117 = math.tanh %116 : vector<1x32xf32>
    %118 = arith.mulf %113, %117 : vector<1x32xf32>
    %119 = vector.extract_strided_slice %2 {offsets = [7, 0], sizes = [1, 128], strides = [1, 1]} : vector<8x128xf32> to vector<1x128xf32>
    %120 = arith.truncf %118 : vector<1x32xf32> to vector<1x32xbf16>
    %cst_15 = arith.constant dense<0.000000e+00> : vector<1x128xf32>
    %121 = tpu.matmul %120, %3, %cst_15 {dimension_numbers = #tpu.dot_dimension_numbers<[1], [0], [0], [1], [0, 0, 1, 1], [], []>} : vector<1x32xbf16>, vector<32x128xbf16>, vector<1x128xf32> -> vector<1x128xf32>
    %122 = arith.addf %119, %121 : vector<1x128xf32>
    %123 = math.tanh %122 : vector<1x128xf32>
    %124 = arith.mulf %4, %123 : vector<1x128xf32>
    %125 = arith.addf %124, %4 : vector<1x128xf32>
    %126 = vector.extract_strided_slice %125 {offsets = [0, 0], sizes = [1, 32], strides = [1, 1]} : vector<1x128xf32> to vector<1x32xf32>
    %127 = vector.extract_strided_slice %125 {offsets = [0, 32], sizes = [1, 32], strides = [1, 1]} : vector<1x128xf32> to vector<1x32xf32>
    %128 = vector.extract_strided_slice %123 {offsets = [0, 64], sizes = [1, 32], strides = [1, 1]} : vector<1x128xf32> to vector<1x32xf32>
    %129 = vector.extract_strided_slice %125 {offsets = [0, 96], sizes = [1, 32], strides = [1, 1]} : vector<1x128xf32> to vector<1x32xf32>
    %130 = arith.mulf %127, %116 : vector<1x32xf32>
    %131 = arith.mulf %126, %128 : vector<1x32xf32>
    %132 = arith.addf %130, %131 : vector<1x32xf32>
    %133 = math.tanh %132 : vector<1x32xf32>
    %134 = arith.mulf %129, %133 : vector<1x32xf32>
    %c0_16 = arith.constant 0 : index
    %c0_17 = arith.constant 0 : index
    %135 = vector.load %arg3[%c0_16, %c0_17] : memref<1x33xf32, #tpu.memory_space<vmem>>, vector<1x33xf32>
    %136 = vector.extract_strided_slice %135 {offsets = [0, 0], sizes = [1, 32], strides = [1, 1]} : vector<1x33xf32> to vector<1x32xf32>
    %137 = vector.extract_strided_slice %135 {offsets = [0, 32], sizes = [1, 1], strides = [1, 1]} : vector<1x33xf32> to vector<1x1xf32>
    %138 = arith.mulf %134, %136 : vector<1x32xf32>
    %cst_18 = arith.constant dense<0.000000e+00> : vector<1xf32>
    %139 = vector.multi_reduction <add>, %138, %cst_18 [1] : vector<1x32xf32> to vector<1xf32>
    %140 = vector.shape_cast %139 : vector<1xf32> to vector<1x1xf32>
    %141 = arith.addf %140, %137 : vector<1x1xf32>
    %c0_19 = arith.constant 0 : index
    %c0_20 = arith.constant 0 : index
    %142 = vector.load %arg4[%c0_19, %c0_20] : memref<1x1xf32, #tpu.memory_space<vmem>>, vector<1x1xf32>
    tpu.vector_store %arg4[%c0_19, %c0_20], %141 {strides = array<i32>} : memref<1x1xf32, #tpu.memory_space<vmem>>, vector<1x1xf32>,
    return
  }
}

</mosaic_0001>

<bundles_post_ra>
// kernel: tpu_custom_call.1
= control target key start
LH: loop header
LB: loop body
LE: loop exit
PB: predicated region body
PF: predicated region fallthrough
CT: control target
= control target key end

     0   :  { %9 = vsyncpa [#allocation3], 0  ;;  %s1153_s0 = inlined_call_operand.hbm [shape: bf16[8,5], index: 0, kind: input, shape index: {}]   ;;  %s1154_s1 = inlined_call_operand.hbm [shape: bf16[5,128], index: 1, kind: input, shape index: {}]   ;;  %s1155_s2 = inlined_call_operand.hbm [shape: bf16[32,128], index: 2, kind: input, shape index: {}]   ;;  %s1156_s3 = inlined_call_operand.vmem [shape: f32[1,33], index: 3, kind: input, shape index: {}]   ;;  %s1157_s4 = inlined_call_operand.hbm [shape: f32[1,1], index: 4, kind: output, shape index: {}]  }
   0x1   :  { %10 = vsyncpa [#allocation6], 0 }
   0x2   :  { %11 = vsyncpa [#allocation4], 0  ;;  %s995_s15 = smov [#allocation5]   ;;  %s996_s17 = smov [#allocation2]  }
   0x3   :  { %s28_s16 = sshll.u32 %s995_s15, 4  ;;  %s18_s18 = sshll.u32 %s996_s17, 4  ;;  %s29_s16 = int_to_ptr.vmem [resolvable:$true] %s28_s16  ;;  %s19_s18 = int_to_ptr.vmem [resolvable:$true] %s18_s18 }
   0x4   :  { %s917_s19 = scalar_lea.vmem %s29_s16, 64  ;;  %p922_p1 = scmp.lt.s32.totalorder %s29_s16, %s29_s16 }
   0x5   :  { %p918_p0 = scmp.ne.s32.totalorder %s29_s16, %s917_s19  ;;  %p923_p2 = scmp.lt.s32.totalorder %s917_s19, %s917_s19 }
   0x7   :  { %p924_p3 = por %p923_p2, %p922_p1 }
   0x9   :  { %p925_p4 = pnand %p924_p3, %p918_p0 }
   0xb   :  { %928 = shalt.err (!%p925_p4)
}
   0xc   :  { %31 = dma.hbm_to_vmem [thread:$0]  %s1154_s1, 64, %s29_s16, [#allocation6]  }
   0xd   :  { %s937_s22 = scalar_lea.vmem %s19_s18, 64  ;;  %p942_p6 = scmp.lt.s32.totalorder %s19_s18, %s19_s18 }
   0xe   :  { %p938_p5 = scmp.ne.s32.totalorder %s19_s18, %s937_s22  ;;  %p943_p7 = scmp.lt.s32.totalorder %s937_s22, %s937_s22 }
  0x10   :  { %p944_p8 = por %p943_p7, %p942_p6 }
  0x12   :  { %p945_p9 = pnand %p944_p8, %p938_p5 }
  0x14   :  { %948 = shalt.err (!%p945_p9)
}
  0x15   :  { %21 = dma.hbm_to_vmem [thread:$0]  %s1153_s0, 64, %s19_s18, [#allocation3]  }
  0x16   :  { %s997_s25 = smov [#allocation7]  }
  0x17   :  { %s37_s26 = sshll.u32 %s997_s25, 4  ;;  %s38_s26 = int_to_ptr.vmem [resolvable:$true] %s37_s26 }
  0x18   :  { %s957_s27 = scalar_lea.vmem %s38_s26, 256  ;;  %p962_p11 = scmp.lt.s32.totalorder %s38_s26, %s38_s26 }
  0x19   :  { %p958_p10 = scmp.ne.s32.totalorder %s38_s26, %s957_s27  ;;  %p963_p12 = scmp.lt.s32.totalorder %s957_s27, %s957_s27 }
  0x1b   :  { %p964_p13 = por %p963_p12, %p962_p11 }
  0x1d   :  { %p965_p0 = pnand %p964_p13, %p958_p10 }
  0x1f   :  { %968 = shalt.err (!%p965_p0)
}
  0x20   :  { %s998_s1 = smov 64   ;;  %s999_s28 = smov 4  }
  0x21   :  { %43 = dma.hbm_to_vmem [thread:$0]  %s1155_s2, 256, %s38_s26, [#allocation6], %s998_s1, %s998_s1, %s999_s28  }
  0x22   :  { %989 = dma.done.wait [#allocation3], 64  }
  0x23   :  { %990 = vsyncadd [#allocation3], 4294967232 }
  0x24   :  { %991 = dma.done.wait [#allocation6], 320  }
  0x25   :  { %992 = vsyncadd [#allocation6], 4294966976  ;;  %vm62_vm0 = vcmask 1041408   ;;  %v1000_v0 = vmov 0.0   ;;  %vm63_vm1 = vcmask 1042432   ;;  %v1001_v1 = vmov 65535  }
  0x26   :  { %793 = vmatprep.subr.bf16.mxu0 %v1000_v0  ;;  %799 = vmatprep.subr.bf16.mxu1 %v1000_v0  ;;  %v64_v2 = vsel %vm62_vm0, 4294967295, %v1001_v1  ;;  %vm1002_vm2 = vmmov 0   ;;  %v57_v4 = vld [vmem:[#allocation5] sm:$0x7]  ;;  %v1049_v6 = vld [vmem:[#allocation7 + $0x8] sm:$0xff]   ;;  %vm58_vm3 = vcmask 39936  }
  0x27   :  { %795 = vmatprep.mubr.msk.bf16.mxu0 %vm1002_vm2, %v1000_v0  ;;  %803 = vmatprep.mubr.msk.bf16.mxu1 %vm1002_vm2, %v1000_v0  ;;  %v65_v3 = vsel %vm63_vm1, %v64_v2, 0  ;;  %v56_v7 = vld [vmem:[#allocation2] sm:$0xf]  ;;  %v1052_v8 = vld [vmem:[#allocation7] sm:$0xff]   ;;  %v1003_v9 = vmov 0   ;;  %s1004_s0 = smov 32  }
  0x28   :  { %v67_v5 = vand.u32 %v65_v3, %v57_v4  ;;  %800 = vmatpush3.bf16.msra.mxu1 %v1049_v6  ;;  %vm125_vm4 = vcmask 261120   ;;  %s1005_s6 = smov 96   ;;  %vm733_vm5 = vcmask 261127   ;;  %vm738_vm6 = vcmask 7175  }
  0x29   :  { %801 = vmatprep.subr.bf16.mxu1 %v1000_v0 }
  0x2a   :  { %794 = vmatpush3.bf16.msra.mxu0 %v67_v5 }
  0x2b   :  { %807 = vmatprep.subr.bf16.mxu0 %v1000_v0 }
  0x2c   :  { %802 = vmatpush3.bf16.msra.mxu1 %v1052_v8 }
  0x2d   :  { %796 = vmatmul.mubr.msk.bf16.vlgmr.msra.gmra.mxu0 %vm58_vm3, %v56_v7  ;;  %815 = vmatprep.subr.bf16.mxu1 %v1000_v0 }
  0x2e   :  { %808 = vmatpush3.bf16.msra.mxu0 %v1049_v6  ;;  %811 = vmatprep.mubr.msk.bf16.mxu0 %vm1002_vm2, %v1000_v0 }
  0x2f   :  { %809 = vmatprep.subr.bf16.mxu0 %v1000_v0  ;;  %804 = vmatmul.mubr.bf16.vlgmr.msra.gmra.mxu1 %v1003_v9 }
  0x30   :  { %816 = vmatpush3.bf16.msra.mxu1 %v1049_v6  ;;  %819 = vmatprep.mubr.msk.bf16.mxu1 %vm1002_vm2, %v1000_v0 }
  0x31   :  { %817 = vmatprep.subr.bf16.mxu1 %v1000_v0 }
  0x32   :  { %810 = vmatpush3.bf16.msra.mxu0 %v1052_v8 }
  0x33   :  { %823 = vmatprep.subr.bf16.mxu0 %v1000_v0 }
  0x34   :  { %818 = vmatpush3.bf16.msra.mxu1 %v1052_v8 }
  0x35   :  { %831 = vmatprep.subr.bf16.mxu1 %v1000_v0 }
  0xed   :  { %v1070_v10 = vpop.f32.mrf.mxu0 }
  0xef   :  { %v797_v11 = vpop.f32.mrf.mxu0  ;;  %v163_v13 = vpop.f32.mrf.mxu1 }
  0xf0   :  { %v169_v14 = vadd.f32 %v163_v13, %v1070_v10 }
  0xf1   :  { %v106_v12 = vpop.f32.mrf.mxu0  ;;  %v805_v16 = vpop.f32.mrf.mxu1 }
  0xf2   :  { %877 = vtanh.f32 %v169_v14 }
  0xf3   :  { %v798_v15 = vpop.f32.mrf.mxu0  ;;  %v166_v17 = vpop.f32.mrf.mxu1 }
  0xf5   :  { %v806_v18 = vpop.f32.mrf.mxu1 }
  0xff   :  { %v878_v19 = vpop.eup %877 }
 0x100   :  { %175 = vrot.lane.b32.xlu0 %v878_v19, %s998_s1  ;;  %v171_v20 = vmul.f32 0.5, %v878_v19 }
 0x102   :  { %v172_v21 = vadd.f32 0.5, %v171_v20 }
 0x104   :  { %v173_v24 = vmul.f32 0.0, %v172_v21 }
 0x172   :  { %v176_v22 = vpop.permute.xlu0 %175 }
 0x173   :  { %v178_v23 = vmul.f32 %v176_v22, %v172_v21 }
 0x175   :  { %180 = vrot.lane.b32.xlu0 %v178_v23, %s1004_s0 }
 0x1e7   :  { %v181_v25 = vpop.permute.xlu0 %180 }
 0x1e8   :  { %v183_v26 = vadd.f32 %v181_v25, %v173_v24 }
 0x1ea   :  { %879 = vtanh.f32 %v183_v26  ;;  %v245_v43 = vrot.slane %v183_v26, 7 }
 0x1f7   :  { %v880_v27 = vpop.eup %879 }
 0x1f8   :  { %186 = vrot.lane.b32.xlu1 %v880_v27, %s998_s1 }
 0x26a   :  { %v187_v28 = vpop.permute.xlu1 %186 }
 0x26b   :  { %v189_v29 = vmul.f32 %v187_v28, %v172_v21 }
 0x26d   :  { %v190_v30 = vpack.c.bf16 %v189_v29, %v189_v29 }
 0x26f   :  { %192 = vrot.lane.b32.xlu1 %v190_v30, %s1004_s0 }
 0x2e1   :  { %v193_v31 = vpop.permute.xlu1 %192 }
 0x2e2   :  { %812 = vmatmul.mubr.msk.bf16.vlgmr.msra.gmra.mxu0 %vm125_vm4, %v193_v31 }
 0x2e3   :  { %824 = vmatpush3.bf16.msra.mxu0 %v1049_v6  ;;  %827 = vmatprep.mubr.msk.bf16.mxu0 %vm1002_vm2, %v1000_v0 }
 0x2e4   :  { %825 = vmatprep.subr.bf16.mxu0 %v1000_v0 }
 0x2e7   :  { %826 = vmatpush3.bf16.msra.mxu0 %v1052_v8 }
 0x2e8   :  { %839 = vmatprep.subr.bf16.mxu0 %v1000_v0 }
 0x3a2   :  { %v231_v32 = vpop.f32.mrf.mxu0 }
 0x3a3   :  { %v238_v33 = vrot.slane %v231_v32, 7 }
 0x3a4   :  { %v813_v34 = vpop.f32.mrf.mxu0 }
 0x3a5   :  { %v240_v35 = vadd.f32 %v238_v33, %v1070_v10 }
 0x3a6   :  { %v234_v36 = vpop.f32.mrf.mxu0 }
 0x3a7   :  { %881 = vtanh.f32 %v240_v35 }
 0x3a8   :  { %v814_v37 = vpop.f32.mrf.mxu0 }
 0x3b4   :  { %v882_v38 = vpop.eup %881 }
 0x3b5   :  { %249 = vrot.lane.b32.xlu0 %v882_v38, %s998_s1  ;;  %v242_v39 = vmul.f32 0.5, %v882_v38 }
 0x3b7   :  { %v243_v40 = vadd.f32 0.5, %v242_v39 }
 0x3b9   :  { %v247_v44 = vmul.f32 %v245_v43, %v243_v40 }
 0x427   :  { %v250_v41 = vpop.permute.xlu0 %249 }
 0x428   :  { %v252_v42 = vmul.f32 %v250_v41, %v243_v40 }
 0x42a   :  { %254 = vrot.lane.b32.xlu1 %v252_v42, %s1004_s0 }
 0x49c   :  { %v255_v45 = vpop.permute.xlu1 %254 }
 0x49d   :  { %v257_v46 = vadd.f32 %v255_v45, %v247_v44 }
 0x49f   :  { %883 = vtanh.f32 %v257_v46  ;;  %v321_v1 = vrot.slane %v257_v46, 7 }
 0x4ac   :  { %v884_v47 = vpop.eup %883 }
 0x4ad   :  { %260 = vrot.lane.b32.xlu0 %v884_v47, %s998_s1 }
 0x51f   :  { %v261_v48 = vpop.permute.xlu0 %260 }
 0x520   :  { %v263_v49 = vmul.f32 %v261_v48, %v243_v40 }
 0x522   :  { %v264_v50 = vpack.c.bf16 %v263_v49, %v263_v49 }
 0x524   :  { %v266_v51 = vshrl.u32 %v264_v50, 16 }
 0x526   :  { %268 = vrot.lane.b32.xlu1 %v266_v51, %s1004_s0 }
 0x598   :  { %v269_v52 = vpop.permute.xlu1 %268 }
 0x599   :  { %820 = vmatmul.mubr.msk.bf16.vlgmr.msra.gmra.mxu1 %vm125_vm4, %v269_v52 }
 0x59a   :  { %832 = vmatpush3.bf16.msra.mxu1 %v1049_v6  ;;  %835 = vmatprep.mubr.msk.bf16.mxu1 %vm1002_vm2, %v1000_v0 }
 0x59b   :  { %833 = vmatprep.subr.bf16.mxu1 %v1000_v0 }
 0x59e   :  { %834 = vmatpush3.bf16.msra.mxu1 %v1052_v8 }
 0x59f   :  { %847 = vmatprep.subr.bf16.mxu1 %v1000_v0 }
 0x659   :  { %v307_v53 = vpop.f32.mrf.mxu1 }
 0x65a   :  { %v314_v54 = vrot.slane %v307_v53, 6 }
 0x65b   :  { %v821_v55 = vpop.f32.mrf.mxu1 }
 0x65c   :  { %v316_v56 = vadd.f32 %v314_v54, %v1070_v10 }
 0x65d   :  { %v310_v57 = vpop.f32.mrf.mxu1 }
 0x65e   :  { %885 = vtanh.f32 %v316_v56 }
 0x65f   :  { %v822_v58 = vpop.f32.mrf.mxu1 }
 0x66b   :  { %v886_v59 = vpop.eup %885 }
 0x66c   :  { %325 = vrot.lane.b32.xlu0 %v886_v59, %s998_s1  ;;  %v318_v60 = vmul.f32 0.5, %v886_v59 }
 0x66e   :  { %v319_v61 = vadd.f32 0.5, %v318_v60 }
 0x670   :  { %v323_v2 = vmul.f32 %v321_v1, %v319_v61 }
 0x6de   :  { %v326_v62 = vpop.permute.xlu0 %325 }
 0x6df   :  { %v328_v63 = vmul.f32 %v326_v62, %v319_v61 }
 0x6e1   :  { %330 = vrot.lane.b32.xlu1 %v328_v63, %s1004_s0 }
 0x753   :  { %v331_v3 = vpop.permute.xlu1 %330 }
 0x754   :  { %v333_v4 = vadd.f32 %v331_v3, %v323_v2 }
 0x756   :  { %887 = vtanh.f32 %v333_v4  ;;  %v396_v25 = vrot.slane %v333_v4, 7 }
 0x763   :  { %v888_v5 = vpop.eup %887 }
 0x764   :  { %336 = vrot.lane.b32.xlu0 %v888_v5, %s998_s1 }
 0x7d6   :  { %v337_v7 = vpop.permute.xlu0 %336 }
 0x7d7   :  { %v339_v9 = vmul.f32 %v337_v7, %v319_v61 }
 0x7d9   :  { %v340_v11 = vpack.c.bf16 %v339_v9, %v339_v9 }
 0x7db   :  { %v342_v12 = vrot.slane %v340_v11, 1 }
 0x7dd   :  { %343 = vrot.lane.b32.xlu1 %v342_v12, %s1004_s0 }
 0x84f   :  { %v344_v13 = vpop.permute.xlu1 %343 }
 0x850   :  { %828 = vmatmul.mubr.msk.bf16.vlgmr.msra.gmra.mxu0 %vm125_vm4, %v344_v13 }
 0x851   :  { %840 = vmatpush3.bf16.msra.mxu0 %v1049_v6  ;;  %843 = vmatprep.mubr.msk.bf16.mxu0 %vm1002_vm2, %v1000_v0 }
 0x852   :  { %841 = vmatprep.subr.bf16.mxu0 %v1000_v0 }
 0x855   :  { %842 = vmatpush3.bf16.msra.mxu0 %v1052_v8 }
 0x856   :  { %855 = vmatprep.subr.bf16.mxu0 %v1000_v0 }
 0x910   :  { %v382_v14 = vpop.f32.mrf.mxu0 }
 0x911   :  { %v389_v15 = vrot.slane %v382_v14, 5 }
 0x912   :  { %v829_v16 = vpop.f32.mrf.mxu0 }
 0x913   :  { %v391_v17 = vadd.f32 %v389_v15, %v1070_v10 }
 0x914   :  { %v385_v18 = vpop.f32.mrf.mxu0 }
 0x915   :  { %889 = vtanh.f32 %v391_v17 }
 0x916   :  { %v830_v19 = vpop.f32.mrf.mxu0 }
 0x922   :  { %v890_v20 = vpop.eup %889 }
 0x923   :  { %400 = vrot.lane.b32.xlu0 %v890_v20, %s998_s1  ;;  %v393_v21 = vmul.f32 0.5, %v890_v20 }
 0x925   :  { %v394_v22 = vadd.f32 0.5, %v393_v21 }
 0x927   :  { %v398_v26 = vmul.f32 %v396_v25, %v394_v22 }
 0x995   :  { %v401_v23 = vpop.permute.xlu0 %400 }
 0x996   :  { %v403_v24 = vmul.f32 %v401_v23, %v394_v22 }
 0x998   :  { %405 = vrot.lane.b32.xlu1 %v403_v24, %s1004_s0 }
 0xa0a   :  { %v406_v27 = vpop.permute.xlu1 %405 }
 0xa0b   :  { %v408_v28 = vadd.f32 %v406_v27, %v398_v26 }
 0xa0d   :  { %891 = vtanh.f32 %v408_v28  ;;  %v473_v47 = vrot.slane %v408_v28, 7 }
 0xa1a   :  { %v892_v29 = vpop.eup %891 }
 0xa1b   :  { %411 = vrot.lane.b32.xlu0 %v892_v29, %s998_s1 }
 0xa8d   :  { %v412_v30 = vpop.permute.xlu0 %411 }
 0xa8e   :  { %v414_v31 = vmul.f32 %v412_v30, %v394_v22 }
 0xa90   :  { %v415_v32 = vpack.c.bf16 %v414_v31, %v414_v31 }
 0xa92   :  { %v417_v33 = vshrl.u32 %v415_v32, 16 }
 0xa94   :  { %v419_v34 = vrot.slane %v417_v33, 1 }
 0xa96   :  { %420 = vrot.lane.b32.xlu1 %v419_v34, %s1004_s0 }
 0xb08   :  { %v421_v35 = vpop.permute.xlu1 %420 }
 0xb09   :  { %836 = vmatmul.mubr.msk.bf16.vlgmr.msra.gmra.mxu1 %vm125_vm4, %v421_v35 }
 0xb0a   :  { %848 = vmatpush3.bf16.msra.mxu1 %v1049_v6  ;;  %851 = vmatprep.mubr.msk.bf16.mxu1 %vm1002_vm2, %v1000_v0 }
 0xb0b   :  { %849 = vmatprep.subr.bf16.mxu1 %v1000_v0 }
 0xb0e   :  { %850 = vmatpush3.bf16.msra.mxu1 %v1052_v8 }
 0xbc9   :  { %v459_v36 = vpop.f32.mrf.mxu1 }
 0xbca   :  { %v466_v37 = vrot.slane %v459_v36, 4 }
 0xbcb   :  { %v837_v38 = vpop.f32.mrf.mxu1 }
 0xbcc   :  { %v468_v39 = vadd.f32 %v466_v37, %v1070_v10 }
 0xbcd   :  { %v462_v40 = vpop.f32.mrf.mxu1 }
 0xbce   :  { %893 = vtanh.f32 %v468_v39 }
 0xbcf   :  { %v838_v41 = vpop.f32.mrf.mxu1 }
 0xbdb   :  { %v894_v42 = vpop.eup %893 }
 0xbdc   :  { %477 = vrot.lane.b32.xlu0 %v894_v42, %s998_s1  ;;  %v470_v43 = vmul.f32 0.5, %v894_v42 }
 0xbde   :  { %v471_v44 = vadd.f32 0.5, %v470_v43 }
 0xbe0   :  { %v475_v48 = vmul.f32 %v473_v47, %v471_v44 }
 0xc4e   :  { %v478_v45 = vpop.permute.xlu0 %477 }
 0xc4f   :  { %v480_v46 = vmul.f32 %v478_v45, %v471_v44 }
 0xc51   :  { %482 = vrot.lane.b32.xlu1 %v480_v46, %s1004_s0 }
 0xcc3   :  { %v483_v49 = vpop.permute.xlu1 %482 }
 0xcc4   :  { %v485_v50 = vadd.f32 %v483_v49, %v475_v48  ;;  %v766_v48 = vld [vmem:[%s1156_s3] ss:$0 sm:$0xff]  ;;  %s1006_s3 = smov [#allocation8]  }
 0xcc5   :  { %s746_s7 = sshll.u32 %s1006_s3, 4  ;;  %s747_s7 = int_to_ptr.vmem [resolvable:$true] %s746_s7 }
 0xcc6   :  { %895 = vtanh.f32 %v485_v50  ;;  %s969_s8 = scalar_lea.vmem %s747_s7, 16  ;;  %s973_s9 = scalar_lea.vmem %s747_s7, 32 }
 0xcc7   :  { %p970_p1 = scmp.ne.s32.totalorder %s747_s7, %s969_s8  ;;  %p974_p2 = scmp.lt.s32.totalorder %s747_s7, %s747_s7 }
 0xcc8   :  { %p975_p3 = scmp.lt.s32.totalorder %s973_s9, %s969_s8 }
 0xcca   :  { %p976_p4 = por %p975_p3, %p974_p2 }
 0xccc   :  { %p977_p5 = pnand %p976_p4, %p970_p1 }
 0xcd3   :  { %v896_v51 = vpop.eup %895 }
 0xcd4   :  { %488 = vrot.lane.b32.xlu0 %v896_v51, %s998_s1 }
 0xd46   :  { %v489_v52 = vpop.permute.xlu0 %488 }
 0xd47   :  { %v491_v53 = vmul.f32 %v489_v52, %v471_v44 }
 0xd49   :  { %v492_v54 = vpack.c.bf16 %v491_v53, %v491_v53 }
 0xd4b   :  { %v494_v55 = vrot.slane %v492_v54, 2 }
 0xd4d   :  { %495 = vrot.lane.b32.xlu1 %v494_v55, %s1004_s0 }
 0xdbf   :  { %v496_v56 = vpop.permute.xlu1 %495 }
 0xdc0   :  { %844 = vmatmul.mubr.msk.bf16.vlgmr.msra.gmra.mxu0 %vm125_vm4, %v496_v56 }
 0xdc1   :  { %856 = vmatpush3.bf16.msra.mxu0 %v1049_v6  ;;  %859 = vmatprep.mubr.msk.bf16.mxu0 %vm1002_vm2, %v1000_v0 }
 0xdc2   :  { %857 = vmatprep.subr.bf16.mxu0 %v1000_v0  ;;  %v548_v0 = vrot.slane %v485_v50, 7 }
 0xdc5   :  { %858 = vmatpush3.bf16.msra.mxu0 %v1052_v8 }
 0xe80   :  { %v534_v57 = vpop.f32.mrf.mxu0 }
 0xe81   :  { %v541_v58 = vrot.slane %v534_v57, 3 }
 0xe82   :  { %v845_v59 = vpop.f32.mrf.mxu0 }
 0xe83   :  { %v543_v60 = vadd.f32 %v541_v58, %v1070_v10 }
 0xe84   :  { %v537_v61 = vpop.f32.mrf.mxu0 }
 0xe85   :  { %897 = vtanh.f32 %v543_v60 }
 0xe86   :  { %v846_v62 = vpop.f32.mrf.mxu0 }
 0xe92   :  { %v898_v63 = vpop.eup %897 }
 0xe93   :  { %552 = vrot.lane.b32.xlu0 %v898_v63, %s998_s1  ;;  %v545_v1 = vmul.f32 0.5, %v898_v63 }
 0xe95   :  { %v546_v6 = vadd.f32 0.5, %v545_v1 }
 0xe97   :  { %v550_v4 = vmul.f32 %v548_v0, %v546_v6 }
 0xf05   :  { %v553_v2 = vpop.permute.xlu0 %552 }
 0xf06   :  { %v555_v3 = vmul.f32 %v553_v2, %v546_v6 }
 0xf08   :  { %557 = vrot.lane.b32.xlu1 %v555_v3, %s1004_s0 }
 0xf7a   :  { %v558_v8 = vpop.permute.xlu1 %557 }
 0xf7b   :  { %v560_v5 = vadd.f32 %v558_v8, %v550_v4 }
 0xf7d   :  { %899 = vtanh.f32 %v560_v5  ;;  %v625_v27 = vrot.slane %v560_v5, 7 }
 0xf8a   :  { %v900_v7 = vpop.eup %899 }
 0xf8b   :  { %563 = vrot.lane.b32.xlu0 %v900_v7, %s998_s1 }
 0xffd   :  { %v564_v9 = vpop.permute.xlu0 %563 }
 0xffe   :  { %v566_v11 = vmul.f32 %v564_v9, %v546_v6 }
0x1000   :  { %v567_v12 = vpack.c.bf16 %v566_v11, %v566_v11 }
0x1002   :  { %v569_v13 = vshrl.u32 %v567_v12, 16 }
0x1004   :  { %v571_v14 = vrot.slane %v569_v13, 2 }
0x1006   :  { %572 = vrot.lane.b32.xlu1 %v571_v14, %s1004_s0 }
0x1078   :  { %v573_v15 = vpop.permute.xlu1 %572 }
0x1079   :  { %852 = vmatmul.mubr.msk.bf16.vlgmr.msra.gmra.mxu1 %vm125_vm4, %v573_v15 }
0x1139   :  { %v611_v16 = vpop.f32.mrf.mxu1 }
0x113a   :  { %v618_v17 = vrot.slane %v611_v16, 2 }
0x113b   :  { %v853_v18 = vpop.f32.mrf.mxu1 }
0x113c   :  { %v620_v19 = vadd.f32 %v618_v17, %v1070_v10 }
0x113d   :  { %v614_v20 = vpop.f32.mrf.mxu1 }
0x113e   :  { %901 = vtanh.f32 %v620_v19 }
0x113f   :  { %v854_v21 = vpop.f32.mrf.mxu1 }
0x114b   :  { %v902_v22 = vpop.eup %901 }
0x114c   :  { %629 = vrot.lane.b32.xlu0 %v902_v22, %s998_s1  ;;  %v622_v23 = vmul.f32 0.5, %v902_v22 }
0x114e   :  { %v623_v24 = vadd.f32 0.5, %v622_v23 }
0x1150   :  { %v627_v28 = vmul.f32 %v625_v27, %v623_v24 }
0x11be   :  { %v630_v25 = vpop.permute.xlu0 %629 }
0x11bf   :  { %v632_v26 = vmul.f32 %v630_v25, %v623_v24 }
0x11c1   :  { %634 = vrot.lane.b32.xlu1 %v632_v26, %s1004_s0 }
0x1233   :  { %v635_v29 = vpop.permute.xlu1 %634 }
0x1234   :  { %v637_v30 = vadd.f32 %v635_v29, %v627_v28 }
0x1236   :  { %903 = vtanh.f32 %v637_v30  ;;  %v700_v49 = vrot.slane %v637_v30, 7 }
0x1243   :  { %v904_v31 = vpop.eup %903 }
0x1244   :  { %640 = vrot.lane.b32.xlu0 %v904_v31, %s998_s1 }
0x12b6   :  { %v641_v32 = vpop.permute.xlu0 %640 }
0x12b7   :  { %v643_v33 = vmul.f32 %v641_v32, %v623_v24 }
0x12b9   :  { %v644_v34 = vpack.c.bf16 %v643_v33, %v643_v33 }
0x12bb   :  { %v646_v35 = vrot.slane %v644_v34, 3 }
0x12bd   :  { %647 = vrot.lane.b32.xlu1 %v646_v35, %s1004_s0 }
0x132f   :  { %v648_v36 = vpop.permute.xlu1 %647 }
0x1330   :  { %860 = vmatmul.mubr.msk.bf16.vlgmr.msra.gmra.mxu0 %vm125_vm4, %v648_v36 }
0x13f0   :  { %v686_v37 = vpop.f32.mrf.mxu0 }
0x13f1   :  { %v693_v38 = vrot.slane %v686_v37, 1 }
0x13f2   :  { %v861_v39 = vpop.f32.mrf.mxu0 }
0x13f3   :  { %v695_v40 = vadd.f32 %v693_v38, %v1070_v10 }
0x13f4   :  { %v689_v41 = vpop.f32.mrf.mxu0 }
0x13f5   :  { %905 = vtanh.f32 %v695_v40 }
0x13f6   :  { %v862_v42 = vpop.f32.mrf.mxu0 }
0x1402   :  { %v906_v43 = vpop.eup %905 }
0x1403   :  { %704 = vrot.lane.b32.xlu0 %v906_v43, %s998_s1  ;;  %v697_v44 = vmul.f32 0.5, %v906_v43 }
0x1405   :  { %v698_v45 = vadd.f32 0.5, %v697_v44 }
0x1407   :  { %v702_v10 = vmul.f32 %v700_v49, %v698_v45 }
0x1475   :  { %v705_v46 = vpop.permute.xlu0 %704 }
0x1476   :  { %v707_v47 = vmul.f32 %v705_v46, %v698_v45 }
0x1478   :  { %709 = vrot.lane.b32.xlu1 %v707_v47, %s1004_s0 }
0x147c   :  { %725 = vrot.lane.b32.xlu1 %v766_v48, %s1005_s6 }
0x14ea   :  { %v710_v50 = vpop.permute.xlu1 %709 }
0x14eb   :  { %v712_v51 = vadd.f32 %v710_v50, %v702_v10 }
0x14ed   :  { %907 = vtanh.f32 %v712_v51 }
0x14ee   :  { %v726_v54 = vpop.permute.xlu1 %725 }
0x14fa   :  { %v908_v52 = vpop.eup %907 }
0x14fb   :  { %715 = vrot.lane.b32.xlu0 %v908_v52, %s998_s1 }
0x156d   :  { %v716_v53 = vpop.permute.xlu0 %715 }
0x156e   :  { %v718_v55 = vmul.f32 %v716_v53, %v698_v45 }
0x1570   :  { %v728_v56 = vmul.f32 %v726_v54, %v718_v55 }
0x1572   :  { %730 = vrot.lane.b32.xlu0 %v728_v56, %s1004_s0 }
0x15e4   :  { %v731_v57 = vpop.permute.xlu0 %730 }
0x15e5   :  { %v734_v58 = vsel %vm733_vm5, %v731_v57, 0.0 }
0x15e6   :  { %735 = vadd.xlane.f32.xlu1 %v734_v58 }
0x166f   :  { %v736_v59 = vpop.xlane.xlu1 %735 }
0x1670   :  { %v737_v60 = vadd.f32 %v736_v59, %v726_v54 }
0x1672   :  { %739 = vst.msk [vmem:[#allocation8 - $0x7] sm:$0x80] %vm738_vm6, %v737_v60 }
0x1673   :  { %980 = shalt.err (!%p977_p5)
}
0x1674   :  { %749 = dma.vmem_to_hbm [thread:$0]  %s747_s7, 16, %s1157_s4, [#allocation4]  }
0x1675   :  { %993 = dma.done.wait [#allocation4], 16  }
0x1676   :  { %994 = vsyncadd [#allocation4], 4294967280 }
0x1677   :  { %753 = vsyncpa [#allocation3], 1 }
0x1678   :  { %754 = vsyncpa [#allocation6], 1 }
0x1679   :  { %755 = vsyncpa [#allocation4], 1 }

</bundles_post_ra>
